<compile_context>
chip_gen: v7x
topology: tpu7x:2x2x1
jax: 0.10.0
libtpu: 0.0.40
codegen_flags: <defaults>
</compile_context>

<pallas_src>
import functools
import math

import jax
import jax.numpy as jnp
from jax import lax
from jax.experimental import pallas as pl
from jax.experimental.pallas import tpu as pltpu


def _round_up(x: int, m: int) -> int:
    return ((x + m - 1) // m) * m


def _gather_kernel(ids_ref, table_hbm, out_ref, slab, sem, *,
                   ts, nbuf, vocab, scale):
    """Gather `ts` embedding rows from HBM into a VMEM slab, scale, store.

    ids_ref   : SMEM (n_pad,) int32      -- scalar-prefetched flat token ids
    table_hbm : HBM  (V, D)              -- embedding table (never fully DMA'd)
    out_ref   : VMEM (ts, D)             -- output tile for this grid step
    slab      : VMEM (ts, D) scratch     -- landing buffer for row DMAs
    sem       : DMA semaphores (nbuf,)   -- ring of in-flight row copies
    """
    base = pl.program_id(0) * ts

    def _token(r):
        # Clamp so out-of-range ids can't read OOB HBM (no runtime check on TPU).
        return jnp.clip(ids_ref[base + r], 0, vocab - 1)

    def _start(r):
        tok = _token(r)
        pltpu.make_async_copy(
            table_hbm.at[pl.ds(tok, 1), :],
            slab.at[pl.ds(r, 1), :],
            sem.at[r % nbuf],
        ).start()

    def _wait(r):
        # Shape-only src (same (1, D) size); wait consumes this row's signal.
        pltpu.make_async_copy(
            table_hbm.at[pl.ds(0, 1), :],
            slab.at[pl.ds(r, 1), :],
            sem.at[r % nbuf],
        ).wait()

    # Prologue: fill the DMA ring (nbuf row copies in flight, issued back-to-back).
    for r in range(nbuf):
        _start(r)

    # Steady state: wait for row r, immediately refill the ring with row r+nbuf.
    def body(r, carry):
        _wait(r)

        @pl.when(r + nbuf < ts)
        def _():
            _start(r + nbuf)

        return carry

    lax.fori_loop(0, ts, body, 0, unroll=min(8, ts))

    # Single dense scale + full-block store for the whole (ts, D) slab.
    out_ref[...] = (slab[...] * scale).astype(out_ref.dtype)


def input_embeddings(ids, table, *, rows_per_tile: int = 256, dma_depth: int = 8):
    """ids: (B, S) int ids, table: (V, D) -> (B, S, D) = table[ids] * sqrt(D)."""
    B, S = ids.shape
    V, D = table.shape
    scale = math.sqrt(float(D))

    n = B * S
    # Rows per grid step: multiple of 8 (sublane), capped by rows_per_tile, and
    # chosen so there are >= 2 grid steps when possible (megacore / pipelining).
    ts = max(8, min(rows_per_tile, _round_up((n + 1) // 2, 8)))
    n_pad = _round_up(n, ts)
    nbuf = min(dma_depth, ts)

    ids_flat = ids.reshape(-1).astype(jnp.int32)
    if n_pad != n:
        ids_flat = jnp.pad(ids_flat, (0, n_pad - n))   # padded rows gather id 0

    kernel = functools.partial(
        _gather_kernel, ts=ts, nbuf=nbuf, vocab=V, scale=scale)

    out_flat = pl.pallas_call(
        kernel,
        out_shape=jax.ShapeDtypeStruct((n_pad, D), table.dtype),
        grid_spec=pltpu.PrefetchScalarGridSpec(
            num_scalar_prefetch=1,                      # flat ids -> SMEM
            grid=(n_pad // ts,),
            in_specs=[
                pl.BlockSpec(memory_space=pl.ANY),      # table stays in HBM
            ],
            out_specs=pl.BlockSpec((ts, D), lambda i, ids: (i, 0)),
            scratch_shapes=[
                pltpu.VMEM((ts, D), table.dtype),       # gather slab
                pltpu.SemaphoreType.DMA((nbuf,)),       # DMA ring semaphores
            ],
        ),
        compiler_params=pltpu.CompilerParams(
            dimension_semantics=("parallel",),
        ),
    )(ids_flat, table)

    return out_flat[:n].reshape(B, S, D)


if __name__ == "__main__":
    d_model = 128
    vocab_size = 64
    batch, seq = 2, 8

    key = jax.random.PRNGKey(0)
    k_ids, k_emb = jax.random.split(key)

    ids = jax.random.randint(k_ids, (batch, seq), minval=0, maxval=vocab_size,
                             dtype=jnp.int32)
    # Deterministic "nn.Embedding" weight init (N(0,1), like PyTorch default).
    table = jax.random.normal(k_emb, (vocab_size, d_model), dtype=jnp.float32)

    out = input_embeddings(ids, table)
    out = jax.block_until_ready(out)

    # Reference check in plain JAX.
    ref = jnp.take(table, ids, axis=0) * math.sqrt(float(d_model))
    assert out.shape == (batch, seq, d_model)
    assert jnp.allclose(out, ref, atol=1e-6, rtol=1e-6)

    print("KERNEL_OK")
</pallas_src>

<mosaic_0001>
module attributes {stable_mosaic.version = 11 : i64} {
  func.func @_gather_kernel(%arg0: i32, %arg1: memref<16xi32, #tpu.memory_space<smem>>, %arg2: memref<64x128xf32, #tpu.memory_space<any>>, %arg3: memref<8x128xf32, #tpu.memory_space<vmem>>, %arg4: memref<8x128xf32, #tpu.memory_space<vmem>>, %arg5: memref<8x!tpu.dma_semaphore, #tpu.memory_space<semaphore_mem>>) attributes {dimension_semantics = [#tpu.dimension_semantics<parallel>], iteration_bounds = array<i64: 2>, scalar_prefetch = 1 : i64, scratch_operands = 2 : i64, tpu.core_type = #tpu.core_type<tc>, window_params = [{}, {transform_indices = @transform_1, window_bounds = array<i64: 8, 128>}]} {
    %c8_i32 = arith.constant 8 : i32
    %0 = arith.muli %arg0, %c8_i32 : i32
    %c0_i32 = arith.constant 0 : i32
    %1 = arith.addi %0, %c0_i32 : i32
    %2 = arith.index_cast %1 : i32 to index
    %3 = memref.load %arg1[%2] : memref<16xi32, #tpu.memory_space<smem>>
    %c0_i32_0 = arith.constant 0 : i32
    %c63_i32 = arith.constant 63 : i32
    %4 = arith.maxsi %c0_i32_0, %3 : i32
    %5 = arith.minsi %c63_i32, %4 : i32
    %c0_i32_1 = arith.constant 0 : i32
    %c0_i32_2 = arith.constant 0 : i32
    %6 = tpu.memref_slice %arg2[%5, %c0_i32_2] : memref<64x128xf32, #tpu.memory_space<any>> -> memref<1x128xf32, #tpu.memory_space<any>>
    %c0_i32_3 = arith.constant 0 : i32
    %c0_i32_4 = arith.constant 0 : i32
    %7 = tpu.memref_slice %arg4[%c0_i32_3, %c0_i32_4] : memref<8x128xf32, #tpu.memory_space<vmem>> -> memref<1x128xf32, #tpu.memory_space<vmem>>
    %8 = tpu.memref_slice %arg5[%c0_i32_1] : memref<8x!tpu.dma_semaphore, #tpu.memory_space<semaphore_mem>> -> memref<1x!tpu.dma_semaphore, #tpu.memory_space<semaphore_mem>>
    %9 = tpu.memref_squeeze %8 : memref<1x!tpu.dma_semaphore, #tpu.memory_space<semaphore_mem>> -> memref<!tpu.dma_semaphore, #tpu.memory_space<semaphore_mem>>
    tpu.enqueue_dma source(%6 : memref<1x128xf32, #tpu.memory_space<any>>) target(%7 : memref<1x128xf32, #tpu.memory_space<vmem>>) target_semaphore(%9 : memref<!tpu.dma_semaphore, #tpu.memory_space<semaphore_mem>>)
    %c1_i32 = arith.constant 1 : i32
    %10 = arith.addi %0, %c1_i32 : i32
    %11 = arith.index_cast %10 : i32 to index
    %12 = memref.load %arg1[%11] : memref<16xi32, #tpu.memory_space<smem>>
    %c0_i32_5 = arith.constant 0 : i32
    %c63_i32_6 = arith.constant 63 : i32
    %13 = arith.maxsi %c0_i32_5, %12 : i32
    %14 = arith.minsi %c63_i32_6, %13 : i32
    %c1_i32_7 = arith.constant 1 : i32
    %c0_i32_8 = arith.constant 0 : i32
    %15 = tpu.memref_slice %arg2[%14, %c0_i32_8] : memref<64x128xf32, #tpu.memory_space<any>> -> memref<1x128xf32, #tpu.memory_space<any>>
    %c1_i32_9 = arith.constant 1 : i32
    %c0_i32_10 = arith.constant 0 : i32
    %16 = tpu.memref_slice %arg4[%c1_i32_9, %c0_i32_10] : memref<8x128xf32, #tpu.memory_space<vmem>> -> memref<1x128xf32, #tpu.memory_space<vmem>>
    %17 = tpu.memref_slice %arg5[%c1_i32_7] : memref<8x!tpu.dma_semaphore, #tpu.memory_space<semaphore_mem>> -> memref<1x!tpu.dma_semaphore, #tpu.memory_space<semaphore_mem>>
    %18 = tpu.memref_squeeze %17 : memref<1x!tpu.dma_semaphore, #tpu.memory_space<semaphore_mem>> -> memref<!tpu.dma_semaphore, #tpu.memory_space<semaphore_mem>>
    tpu.enqueue_dma source(%15 : memref<1x128xf32, #tpu.memory_space<any>>) target(%16 : memref<1x128xf32, #tpu.memory_space<vmem>>) target_semaphore(%18 : memref<!tpu.dma_semaphore, #tpu.memory_space<semaphore_mem>>)
    %c2_i32 = arith.constant 2 : i32
    %19 = arith.addi %0, %c2_i32 : i32
    %20 = arith.index_cast %19 : i32 to index
    %21 = memref.load %arg1[%20] : memref<16xi32, #tpu.memory_space<smem>>
    %c0_i32_11 = arith.constant 0 : i32
    %c63_i32_12 = arith.constant 63 : i32
    %22 = arith.maxsi %c0_i32_11, %21 : i32
    %23 = arith.minsi %c63_i32_12, %22 : i32
    %c2_i32_13 = arith.constant 2 : i32
    %c0_i32_14 = arith.constant 0 : i32
    %24 = tpu.memref_slice %arg2[%23, %c0_i32_14] : memref<64x128xf32, #tpu.memory_space<any>> -> memref<1x128xf32, #tpu.memory_space<any>>
    %c2_i32_15 = arith.constant 2 : i32
    %c0_i32_16 = arith.constant 0 : i32
    %25 = tpu.memref_slice %arg4[%c2_i32_15, %c0_i32_16] : memref<8x128xf32, #tpu.memory_space<vmem>> -> memref<1x128xf32, #tpu.memory_space<vmem>>
    %26 = tpu.memref_slice %arg5[%c2_i32_13] : memref<8x!tpu.dma_semaphore, #tpu.memory_space<semaphore_mem>> -> memref<1x!tpu.dma_semaphore, #tpu.memory_space<semaphore_mem>>
    %27 = tpu.memref_squeeze %26 : memref<1x!tpu.dma_semaphore, #tpu.memory_space<semaphore_mem>> -> memref<!tpu.dma_semaphore, #tpu.memory_space<semaphore_mem>>
    tpu.enqueue_dma source(%24 : memref<1x128xf32, #tpu.memory_space<any>>) target(%25 : memref<1x128xf32, #tpu.memory_space<vmem>>) target_semaphore(%27 : memref<!tpu.dma_semaphore, #tpu.memory_space<semaphore_mem>>)
    %c3_i32 = arith.constant 3 : i32
    %28 = arith.addi %0, %c3_i32 : i32
    %29 = arith.index_cast %28 : i32 to index
    %30 = memref.load %arg1[%29] : memref<16xi32, #tpu.memory_space<smem>>
    %c0_i32_17 = arith.constant 0 : i32
    %c63_i32_18 = arith.constant 63 : i32
    %31 = arith.maxsi %c0_i32_17, %30 : i32
    %32 = arith.minsi %c63_i32_18, %31 : i32
    %c3_i32_19 = arith.constant 3 : i32
    %c0_i32_20 = arith.constant 0 : i32
    %33 = tpu.memref_slice %arg2[%32, %c0_i32_20] : memref<64x128xf32, #tpu.memory_space<any>> -> memref<1x128xf32, #tpu.memory_space<any>>
    %c3_i32_21 = arith.constant 3 : i32
    %c0_i32_22 = arith.constant 0 : i32
    %34 = tpu.memref_slice %arg4[%c3_i32_21, %c0_i32_22] : memref<8x128xf32, #tpu.memory_space<vmem>> -> memref<1x128xf32, #tpu.memory_space<vmem>>
    %35 = tpu.memref_slice %arg5[%c3_i32_19] : memref<8x!tpu.dma_semaphore, #tpu.memory_space<semaphore_mem>> -> memref<1x!tpu.dma_semaphore, #tpu.memory_space<semaphore_mem>>
    %36 = tpu.memref_squeeze %35 : memref<1x!tpu.dma_semaphore, #tpu.memory_space<semaphore_mem>> -> memref<!tpu.dma_semaphore, #tpu.memory_space<semaphore_mem>>
    tpu.enqueue_dma source(%33 : memref<1x128xf32, #tpu.memory_space<any>>) target(%34 : memref<1x128xf32, #tpu.memory_space<vmem>>) target_semaphore(%36 : memref<!tpu.dma_semaphore, #tpu.memory_space<semaphore_mem>>)
    %c4_i32 = arith.constant 4 : i32
    %37 = arith.addi %0, %c4_i32 : i32
    %38 = arith.index_cast %37 : i32 to index
    %39 = memref.load %arg1[%38] : memref<16xi32, #tpu.memory_space<smem>>
    %c0_i32_23 = arith.constant 0 : i32
    %c63_i32_24 = arith.constant 63 : i32
    %40 = arith.maxsi %c0_i32_23, %39 : i32
    %41 = arith.minsi %c63_i32_24, %40 : i32
    %c4_i32_25 = arith.constant 4 : i32
    %c0_i32_26 = arith.constant 0 : i32
    %42 = tpu.memref_slice %arg2[%41, %c0_i32_26] : memref<64x128xf32, #tpu.memory_space<any>> -> memref<1x128xf32, #tpu.memory_space<any>>
    %c4_i32_27 = arith.constant 4 : i32
    %c0_i32_28 = arith.constant 0 : i32
    %43 = tpu.memref_slice %arg4[%c4_i32_27, %c0_i32_28] : memref<8x128xf32, #tpu.memory_space<vmem>> -> memref<1x128xf32, #tpu.memory_space<vmem>>
    %44 = tpu.memref_slice %arg5[%c4_i32_25] : memref<8x!tpu.dma_semaphore, #tpu.memory_space<semaphore_mem>> -> memref<1x!tpu.dma_semaphore, #tpu.memory_space<semaphore_mem>>
    %45 = tpu.memref_squeeze %44 : memref<1x!tpu.dma_semaphore, #tpu.memory_space<semaphore_mem>> -> memref<!tpu.dma_semaphore, #tpu.memory_space<semaphore_mem>>
    tpu.enqueue_dma source(%42 : memref<1x128xf32, #tpu.memory_space<any>>) target(%43 : memref<1x128xf32, #tpu.memory_space<vmem>>) target_semaphore(%45 : memref<!tpu.dma_semaphore, #tpu.memory_space<semaphore_mem>>)
    %c5_i32 = arith.constant 5 : i32
    %46 = arith.addi %0, %c5_i32 : i32
    %47 = arith.index_cast %46 : i32 to index
    %48 = memref.load %arg1[%47] : memref<16xi32, #tpu.memory_space<smem>>
    %c0_i32_29 = arith.constant 0 : i32
    %c63_i32_30 = arith.constant 63 : i32
    %49 = arith.maxsi %c0_i32_29, %48 : i32
    %50 = arith.minsi %c63_i32_30, %49 : i32
    %c5_i32_31 = arith.constant 5 : i32
    %c0_i32_32 = arith.constant 0 : i32
    %51 = tpu.memref_slice %arg2[%50, %c0_i32_32] : memref<64x128xf32, #tpu.memory_space<any>> -> memref<1x128xf32, #tpu.memory_space<any>>
    %c5_i32_33 = arith.constant 5 : i32
    %c0_i32_34 = arith.constant 0 : i32
    %52 = tpu.memref_slice %arg4[%c5_i32_33, %c0_i32_34] : memref<8x128xf32, #tpu.memory_space<vmem>> -> memref<1x128xf32, #tpu.memory_space<vmem>>
    %53 = tpu.memref_slice %arg5[%c5_i32_31] : memref<8x!tpu.dma_semaphore, #tpu.memory_space<semaphore_mem>> -> memref<1x!tpu.dma_semaphore, #tpu.memory_space<semaphore_mem>>
    %54 = tpu.memref_squeeze %53 : memref<1x!tpu.dma_semaphore, #tpu.memory_space<semaphore_mem>> -> memref<!tpu.dma_semaphore, #tpu.memory_space<semaphore_mem>>
    tpu.enqueue_dma source(%51 : memref<1x128xf32, #tpu.memory_space<any>>) target(%52 : memref<1x128xf32, #tpu.memory_space<vmem>>) target_semaphore(%54 : memref<!tpu.dma_semaphore, #tpu.memory_space<semaphore_mem>>)
    %c6_i32 = arith.constant 6 : i32
    %55 = arith.addi %0, %c6_i32 : i32
    %56 = arith.index_cast %55 : i32 to index
    %57 = memref.load %arg1[%56] : memref<16xi32, #tpu.memory_space<smem>>
    %c0_i32_35 = arith.constant 0 : i32
    %c63_i32_36 = arith.constant 63 : i32
    %58 = arith.maxsi %c0_i32_35, %57 : i32
    %59 = arith.minsi %c63_i32_36, %58 : i32
    %c6_i32_37 = arith.constant 6 : i32
    %c0_i32_38 = arith.constant 0 : i32
    %60 = tpu.memref_slice %arg2[%59, %c0_i32_38] : memref<64x128xf32, #tpu.memory_space<any>> -> memref<1x128xf32, #tpu.memory_space<any>>
    %c6_i32_39 = arith.constant 6 : i32
    %c0_i32_40 = arith.constant 0 : i32
    %61 = tpu.memref_slice %arg4[%c6_i32_39, %c0_i32_40] : memref<8x128xf32, #tpu.memory_space<vmem>> -> memref<1x128xf32, #tpu.memory_space<vmem>>
    %62 = tpu.memref_slice %arg5[%c6_i32_37] : memref<8x!tpu.dma_semaphore, #tpu.memory_space<semaphore_mem>> -> memref<1x!tpu.dma_semaphore, #tpu.memory_space<semaphore_mem>>
    %63 = tpu.memref_squeeze %62 : memref<1x!tpu.dma_semaphore, #tpu.memory_space<semaphore_mem>> -> memref<!tpu.dma_semaphore, #tpu.memory_space<semaphore_mem>>
    tpu.enqueue_dma source(%60 : memref<1x128xf32, #tpu.memory_space<any>>) target(%61 : memref<1x128xf32, #tpu.memory_space<vmem>>) target_semaphore(%63 : memref<!tpu.dma_semaphore, #tpu.memory_space<semaphore_mem>>)
    %c7_i32 = arith.constant 7 : i32
    %64 = arith.addi %0, %c7_i32 : i32
    %65 = arith.index_cast %64 : i32 to index
    %66 = memref.load %arg1[%65] : memref<16xi32, #tpu.memory_space<smem>>
    %c0_i32_41 = arith.constant 0 : i32
    %c63_i32_42 = arith.constant 63 : i32
    %67 = arith.maxsi %c0_i32_41, %66 : i32
    %68 = arith.minsi %c63_i32_42, %67 : i32
    %c7_i32_43 = arith.constant 7 : i32
    %c0_i32_44 = arith.constant 0 : i32
    %69 = tpu.memref_slice %arg2[%68, %c0_i32_44] : memref<64x128xf32, #tpu.memory_space<any>> -> memref<1x128xf32, #tpu.memory_space<any>>
    %c7_i32_45 = arith.constant 7 : i32
    %c0_i32_46 = arith.constant 0 : i32
    %70 = tpu.memref_slice %arg4[%c7_i32_45, %c0_i32_46] : memref<8x128xf32, #tpu.memory_space<vmem>> -> memref<1x128xf32, #tpu.memory_space<vmem>>
    %71 = tpu.memref_slice %arg5[%c7_i32_43] : memref<8x!tpu.dma_semaphore, #tpu.memory_space<semaphore_mem>> -> memref<1x!tpu.dma_semaphore, #tpu.memory_space<semaphore_mem>>
    %72 = tpu.memref_squeeze %71 : memref<1x!tpu.dma_semaphore, #tpu.memory_space<semaphore_mem>> -> memref<!tpu.dma_semaphore, #tpu.memory_space<semaphore_mem>>
    tpu.enqueue_dma source(%69 : memref<1x128xf32, #tpu.memory_space<any>>) target(%70 : memref<1x128xf32, #tpu.memory_space<vmem>>) target_semaphore(%72 : memref<!tpu.dma_semaphore, #tpu.memory_space<semaphore_mem>>)
    %c0_i32_47 = arith.constant 0 : i32
    %c8_i32_48 = arith.constant 8 : i32
    %c0_i32_49 = arith.constant 0 : i32
    %73 = arith.cmpi eq, %c8_i32_48, %c0_i32_49 : i32
    %c1_i32_50 = arith.constant 1 : i32
    %74 = arith.select %73, %c1_i32_50, %c8_i32_48 : i32
    %75 = arith.remsi %c0_i32_47, %74 : i32
    %c0_i32_51 = arith.constant 0 : i32
    %76 = arith.cmpi ne, %75, %c0_i32_51 : i32
    %c0_i32_52 = arith.constant 0 : i32
    %77 = arith.cmpi slt, %75, %c0_i32_52 : i32
    %c0_i32_53 = arith.constant 0 : i32
    %78 = arith.cmpi slt, %74, %c0_i32_53 : i32
    %79 = arith.xori %77, %78 : i1
    %80 = arith.andi %79, %76 : i1
    %81 = arith.addi %75, %74 : i32
    %82 = arith.select %80, %81, %75 : i32
    %c0_i32_54 = arith.constant 0 : i32
    %c0_i32_55 = arith.constant 0 : i32
    %83 = tpu.memref_slice %arg2[%c0_i32_54, %c0_i32_55] : memref<64x128xf32, #tpu.memory_space<any>> -> memref<1x128xf32, #tpu.memory_space<any>>
    %c0_i32_56 = arith.constant 0 : i32
    %84 = tpu.memref_slice %arg4[%c0_i32_47, %c0_i32_56] : memref<8x128xf32, #tpu.memory_space<vmem>> -> memref<1x128xf32, #tpu.memory_space<vmem>>
    %85 = tpu.memref_slice %arg5[%82] : memref<8x!tpu.dma_semaphore, #tpu.memory_space<semaphore_mem>> -> memref<1x!tpu.dma_semaphore, #tpu.memory_space<semaphore_mem>>
    %86 = tpu.memref_squeeze %85 : memref<1x!tpu.dma_semaphore, #tpu.memory_space<semaphore_mem>> -> memref<!tpu.dma_semaphore, #tpu.memory_space<semaphore_mem>>
    tpu.wait_dma2 semaphore(%86 : memref<!tpu.dma_semaphore, #tpu.memory_space<semaphore_mem>>) src(%83 : memref<1x128xf32, #tpu.memory_space<any>>) dst(%84 : memref<1x128xf32, #tpu.memory_space<vmem>>)
    %c8_i32_57 = arith.constant 8 : i32
    %87 = arith.addi %c0_i32_47, %c8_i32_57 : i32
    %c8_i32_58 = arith.constant 8 : i32
    %88 = arith.cmpi slt, %87, %c8_i32_58 : i32
    %89 = arith.extui %88 : i1 to i32
    %c0_i32_59 = arith.constant 0 : i32
    %90 = arith.cmpi ne, %89, %c0_i32_59 : i32
    scf.if %90 {
      %c8_i32_155 = arith.constant 8 : i32
      %221 = arith.addi %c0_i32_47, %c8_i32_155 : i32
      %222 = arith.addi %0, %221 : i32
      %223 = arith.index_cast %222 : i32 to index
      %224 = memref.load %arg1[%223] : memref<16xi32, #tpu.memory_space<smem>>
      %c0_i32_156 = arith.constant 0 : i32
      %c63_i32_157 = arith.constant 63 : i32
      %225 = arith.maxsi %c0_i32_156, %224 : i32
      %226 = arith.minsi %c63_i32_157, %225 : i32
      %c8_i32_158 = arith.constant 8 : i32
      %c0_i32_159 = arith.constant 0 : i32
      %227 = arith.cmpi eq, %c8_i32_158, %c0_i32_159 : i32
      %c1_i32_160 = arith.constant 1 : i32
      %228 = arith.select %227, %c1_i32_160, %c8_i32_158 : i32
      %229 = arith.remsi %221, %228 : i32
      %c0_i32_161 = arith.constant 0 : i32
      %230 = arith.cmpi ne, %229, %c0_i32_161 : i32
      %c0_i32_162 = arith.constant 0 : i32
      %231 = arith.cmpi slt, %229, %c0_i32_162 : i32
      %c0_i32_163 = arith.constant 0 : i32
      %232 = arith.cmpi slt, %228, %c0_i32_163 : i32
      %233 = arith.xori %231, %232 : i1
      %234 = arith.andi %233, %230 : i1
      %235 = arith.addi %229, %228 : i32
      %236 = arith.select %234, %235, %229 : i32
      %c0_i32_164 = arith.constant 0 : i32
      %237 = tpu.memref_slice %arg2[%226, %c0_i32_164] : memref<64x128xf32, #tpu.memory_space<any>> -> memref<1x128xf32, #tpu.memory_space<any>>
      %c0_i32_165 = arith.constant 0 : i32
      %238 = tpu.memref_slice %arg4[%221, %c0_i32_165] : memref<8x128xf32, #tpu.memory_space<vmem>> -> memref<1x128xf32, #tpu.memory_space<vmem>>
      %239 = tpu.memref_slice %arg5[%236] : memref<8x!tpu.dma_semaphore, #tpu.memory_space<semaphore_mem>> -> memref<1x!tpu.dma_semaphore, #tpu.memory_space<semaphore_mem>>
      %240 = tpu.memref_squeeze %239 : memref<1x!tpu.dma_semaphore, #tpu.memory_space<semaphore_mem>> -> memref<!tpu.dma_semaphore, #tpu.memory_space<semaphore_mem>>
      tpu.enqueue_dma source(%237 : memref<1x128xf32, #tpu.memory_space<any>>) target(%238 : memref<1x128xf32, #tpu.memory_space<vmem>>) target_semaphore(%240 : memref<!tpu.dma_semaphore, #tpu.memory_space<semaphore_mem>>)
    } else {
    }
    %c1_i32_60 = arith.constant 1 : i32
    %c8_i32_61 = arith.constant 8 : i32
    %c0_i32_62 = arith.constant 0 : i32
    %91 = arith.cmpi eq, %c8_i32_61, %c0_i32_62 : i32
    %c1_i32_63 = arith.constant 1 : i32
    %92 = arith.select %91, %c1_i32_63, %c8_i32_61 : i32
    %93 = arith.remsi %c1_i32_60, %92 : i32
    %c0_i32_64 = arith.constant 0 : i32
    %94 = arith.cmpi ne, %93, %c0_i32_64 : i32
    %c0_i32_65 = arith.constant 0 : i32
    %95 = arith.cmpi slt, %93, %c0_i32_65 : i32
    %c0_i32_66 = arith.constant 0 : i32
    %96 = arith.cmpi slt, %92, %c0_i32_66 : i32
    %97 = arith.xori %95, %96 : i1
    %98 = arith.andi %97, %94 : i1
    %99 = arith.addi %93, %92 : i32
    %100 = arith.select %98, %99, %93 : i32
    %c0_i32_67 = arith.constant 0 : i32
    %c0_i32_68 = arith.constant 0 : i32
    %101 = tpu.memref_slice %arg2[%c0_i32_67, %c0_i32_68] : memref<64x128xf32, #tpu.memory_space<any>> -> memref<1x128xf32, #tpu.memory_space<any>>
    %c0_i32_69 = arith.constant 0 : i32
    %102 = tpu.memref_slice %arg4[%c1_i32_60, %c0_i32_69] : memref<8x128xf32, #tpu.memory_space<vmem>> -> memref<1x128xf32, #tpu.memory_space<vmem>>
    %103 = tpu.memref_slice %arg5[%100] : memref<8x!tpu.dma_semaphore, #tpu.memory_space<semaphore_mem>> -> memref<1x!tpu.dma_semaphore, #tpu.memory_space<semaphore_mem>>
    %104 = tpu.memref_squeeze %103 : memref<1x!tpu.dma_semaphore, #tpu.memory_space<semaphore_mem>> -> memref<!tpu.dma_semaphore, #tpu.memory_space<semaphore_mem>>
    tpu.wait_dma2 semaphore(%104 : memref<!tpu.dma_semaphore, #tpu.memory_space<semaphore_mem>>) src(%101 : memref<1x128xf32, #tpu.memory_space<any>>) dst(%102 : memref<1x128xf32, #tpu.memory_space<vmem>>)
    %c8_i32_70 = arith.constant 8 : i32
    %105 = arith.addi %c1_i32_60, %c8_i32_70 : i32
    %c8_i32_71 = arith.constant 8 : i32
    %106 = arith.cmpi slt, %105, %c8_i32_71 : i32
    %107 = arith.extui %106 : i1 to i32
    %c0_i32_72 = arith.constant 0 : i32
    %108 = arith.cmpi ne, %107, %c0_i32_72 : i32
    scf.if %108 {
      %c8_i32_155 = arith.constant 8 : i32
      %221 = arith.addi %c1_i32_60, %c8_i32_155 : i32
      %222 = arith.addi %0, %221 : i32
      %223 = arith.index_cast %222 : i32 to index
      %224 = memref.load %arg1[%223] : memref<16xi32, #tpu.memory_space<smem>>
      %c0_i32_156 = arith.constant 0 : i32
      %c63_i32_157 = arith.constant 63 : i32
      %225 = arith.maxsi %c0_i32_156, %224 : i32
      %226 = arith.minsi %c63_i32_157, %225 : i32
      %c8_i32_158 = arith.constant 8 : i32
      %c0_i32_159 = arith.constant 0 : i32
      %227 = arith.cmpi eq, %c8_i32_158, %c0_i32_159 : i32
      %c1_i32_160 = arith.constant 1 : i32
      %228 = arith.select %227, %c1_i32_160, %c8_i32_158 : i32
      %229 = arith.remsi %221, %228 : i32
      %c0_i32_161 = arith.constant 0 : i32
      %230 = arith.cmpi ne, %229, %c0_i32_161 : i32
      %c0_i32_162 = arith.constant 0 : i32
      %231 = arith.cmpi slt, %229, %c0_i32_162 : i32
      %c0_i32_163 = arith.constant 0 : i32
      %232 = arith.cmpi slt, %228, %c0_i32_163 : i32
      %233 = arith.xori %231, %232 : i1
      %234 = arith.andi %233, %230 : i1
      %235 = arith.addi %229, %228 : i32
      %236 = arith.select %234, %235, %229 : i32
      %c0_i32_164 = arith.constant 0 : i32
      %237 = tpu.memref_slice %arg2[%226, %c0_i32_164] : memref<64x128xf32, #tpu.memory_space<any>> -> memref<1x128xf32, #tpu.memory_space<any>>
      %c0_i32_165 = arith.constant 0 : i32
      %238 = tpu.memref_slice %arg4[%221, %c0_i32_165] : memref<8x128xf32, #tpu.memory_space<vmem>> -> memref<1x128xf32, #tpu.memory_space<vmem>>
      %239 = tpu.memref_slice %arg5[%236] : memref<8x!tpu.dma_semaphore, #tpu.memory_space<semaphore_mem>> -> memref<1x!tpu.dma_semaphore, #tpu.memory_space<semaphore_mem>>
      %240 = tpu.memref_squeeze %239 : memref<1x!tpu.dma_semaphore, #tpu.memory_space<semaphore_mem>> -> memref<!tpu.dma_semaphore, #tpu.memory_space<semaphore_mem>>
      tpu.enqueue_dma source(%237 : memref<1x128xf32, #tpu.memory_space<any>>) target(%238 : memref<1x128xf32, #tpu.memory_space<vmem>>) target_semaphore(%240 : memref<!tpu.dma_semaphore, #tpu.memory_space<semaphore_mem>>)
    } else {
    }
    %c2_i32_73 = arith.constant 2 : i32
    %c8_i32_74 = arith.constant 8 : i32
    %c0_i32_75 = arith.constant 0 : i32
    %109 = arith.cmpi eq, %c8_i32_74, %c0_i32_75 : i32
    %c1_i32_76 = arith.constant 1 : i32
    %110 = arith.select %109, %c1_i32_76, %c8_i32_74 : i32
    %111 = arith.remsi %c2_i32_73, %110 : i32
    %c0_i32_77 = arith.constant 0 : i32
    %112 = arith.cmpi ne, %111, %c0_i32_77 : i32
    %c0_i32_78 = arith.constant 0 : i32
    %113 = arith.cmpi slt, %111, %c0_i32_78 : i32
    %c0_i32_79 = arith.constant 0 : i32
    %114 = arith.cmpi slt, %110, %c0_i32_79 : i32
    %115 = arith.xori %113, %114 : i1
    %116 = arith.andi %115, %112 : i1
    %117 = arith.addi %111, %110 : i32
    %118 = arith.select %116, %117, %111 : i32
    %c0_i32_80 = arith.constant 0 : i32
    %c0_i32_81 = arith.constant 0 : i32
    %119 = tpu.memref_slice %arg2[%c0_i32_80, %c0_i32_81] : memref<64x128xf32, #tpu.memory_space<any>> -> memref<1x128xf32, #tpu.memory_space<any>>
    %c0_i32_82 = arith.constant 0 : i32
    %120 = tpu.memref_slice %arg4[%c2_i32_73, %c0_i32_82] : memref<8x128xf32, #tpu.memory_space<vmem>> -> memref<1x128xf32, #tpu.memory_space<vmem>>
    %121 = tpu.memref_slice %arg5[%118] : memref<8x!tpu.dma_semaphore, #tpu.memory_space<semaphore_mem>> -> memref<1x!tpu.dma_semaphore, #tpu.memory_space<semaphore_mem>>
    %122 = tpu.memref_squeeze %121 : memref<1x!tpu.dma_semaphore, #tpu.memory_space<semaphore_mem>> -> memref<!tpu.dma_semaphore, #tpu.memory_space<semaphore_mem>>
    tpu.wait_dma2 semaphore(%122 : memref<!tpu.dma_semaphore, #tpu.memory_space<semaphore_mem>>) src(%119 : memref<1x128xf32, #tpu.memory_space<any>>) dst(%120 : memref<1x128xf32, #tpu.memory_space<vmem>>)
    %c8_i32_83 = arith.constant 8 : i32
    %123 = arith.addi %c2_i32_73, %c8_i32_83 : i32
    %c8_i32_84 = arith.constant 8 : i32
    %124 = arith.cmpi slt, %123, %c8_i32_84 : i32
    %125 = arith.extui %124 : i1 to i32
    %c0_i32_85 = arith.constant 0 : i32
    %126 = arith.cmpi ne, %125, %c0_i32_85 : i32
    scf.if %126 {
      %c8_i32_155 = arith.constant 8 : i32
      %221 = arith.addi %c2_i32_73, %c8_i32_155 : i32
      %222 = arith.addi %0, %221 : i32
      %223 = arith.index_cast %222 : i32 to index
      %224 = memref.load %arg1[%223] : memref<16xi32, #tpu.memory_space<smem>>
      %c0_i32_156 = arith.constant 0 : i32
      %c63_i32_157 = arith.constant 63 : i32
      %225 = arith.maxsi %c0_i32_156, %224 : i32
      %226 = arith.minsi %c63_i32_157, %225 : i32
      %c8_i32_158 = arith.constant 8 : i32
      %c0_i32_159 = arith.constant 0 : i32
      %227 = arith.cmpi eq, %c8_i32_158, %c0_i32_159 : i32
      %c1_i32_160 = arith.constant 1 : i32
      %228 = arith.select %227, %c1_i32_160, %c8_i32_158 : i32
      %229 = arith.remsi %221, %228 : i32
      %c0_i32_161 = arith.constant 0 : i32
      %230 = arith.cmpi ne, %229, %c0_i32_161 : i32
      %c0_i32_162 = arith.constant 0 : i32
      %231 = arith.cmpi slt, %229, %c0_i32_162 : i32
      %c0_i32_163 = arith.constant 0 : i32
      %232 = arith.cmpi slt, %228, %c0_i32_163 : i32
      %233 = arith.xori %231, %232 : i1
      %234 = arith.andi %233, %230 : i1
      %235 = arith.addi %229, %228 : i32
      %236 = arith.select %234, %235, %229 : i32
      %c0_i32_164 = arith.constant 0 : i32
      %237 = tpu.memref_slice %arg2[%226, %c0_i32_164] : memref<64x128xf32, #tpu.memory_space<any>> -> memref<1x128xf32, #tpu.memory_space<any>>
      %c0_i32_165 = arith.constant 0 : i32
      %238 = tpu.memref_slice %arg4[%221, %c0_i32_165] : memref<8x128xf32, #tpu.memory_space<vmem>> -> memref<1x128xf32, #tpu.memory_space<vmem>>
      %239 = tpu.memref_slice %arg5[%236] : memref<8x!tpu.dma_semaphore, #tpu.memory_space<semaphore_mem>> -> memref<1x!tpu.dma_semaphore, #tpu.memory_space<semaphore_mem>>
      %240 = tpu.memref_squeeze %239 : memref<1x!tpu.dma_semaphore, #tpu.memory_space<semaphore_mem>> -> memref<!tpu.dma_semaphore, #tpu.memory_space<semaphore_mem>>
      tpu.enqueue_dma source(%237 : memref<1x128xf32, #tpu.memory_space<any>>) target(%238 : memref<1x128xf32, #tpu.memory_space<vmem>>) target_semaphore(%240 : memref<!tpu.dma_semaphore, #tpu.memory_space<semaphore_mem>>)
    } else {
    }
    %c3_i32_86 = arith.constant 3 : i32
    %c8_i32_87 = arith.constant 8 : i32
    %c0_i32_88 = arith.constant 0 : i32
    %127 = arith.cmpi eq, %c8_i32_87, %c0_i32_88 : i32
    %c1_i32_89 = arith.constant 1 : i32
    %128 = arith.select %127, %c1_i32_89, %c8_i32_87 : i32
    %129 = arith.remsi %c3_i32_86, %128 : i32
    %c0_i32_90 = arith.constant 0 : i32
    %130 = arith.cmpi ne, %129, %c0_i32_90 : i32
    %c0_i32_91 = arith.constant 0 : i32
    %131 = arith.cmpi slt, %129, %c0_i32_91 : i32
    %c0_i32_92 = arith.constant 0 : i32
    %132 = arith.cmpi slt, %128, %c0_i32_92 : i32
    %133 = arith.xori %131, %132 : i1
    %134 = arith.andi %133, %130 : i1
    %135 = arith.addi %129, %128 : i32
    %136 = arith.select %134, %135, %129 : i32
    %c0_i32_93 = arith.constant 0 : i32
    %c0_i32_94 = arith.constant 0 : i32
    %137 = tpu.memref_slice %arg2[%c0_i32_93, %c0_i32_94] : memref<64x128xf32, #tpu.memory_space<any>> -> memref<1x128xf32, #tpu.memory_space<any>>
    %c0_i32_95 = arith.constant 0 : i32
    %138 = tpu.memref_slice %arg4[%c3_i32_86, %c0_i32_95] : memref<8x128xf32, #tpu.memory_space<vmem>> -> memref<1x128xf32, #tpu.memory_space<vmem>>
    %139 = tpu.memref_slice %arg5[%136] : memref<8x!tpu.dma_semaphore, #tpu.memory_space<semaphore_mem>> -> memref<1x!tpu.dma_semaphore, #tpu.memory_space<semaphore_mem>>
    %140 = tpu.memref_squeeze %139 : memref<1x!tpu.dma_semaphore, #tpu.memory_space<semaphore_mem>> -> memref<!tpu.dma_semaphore, #tpu.memory_space<semaphore_mem>>
    tpu.wait_dma2 semaphore(%140 : memref<!tpu.dma_semaphore, #tpu.memory_space<semaphore_mem>>) src(%137 : memref<1x128xf32, #tpu.memory_space<any>>) dst(%138 : memref<1x128xf32, #tpu.memory_space<vmem>>)
    %c8_i32_96 = arith.constant 8 : i32
    %141 = arith.addi %c3_i32_86, %c8_i32_96 : i32
    %c8_i32_97 = arith.constant 8 : i32
    %142 = arith.cmpi slt, %141, %c8_i32_97 : i32
    %143 = arith.extui %142 : i1 to i32
    %c0_i32_98 = arith.constant 0 : i32
    %144 = arith.cmpi ne, %143, %c0_i32_98 : i32
    scf.if %144 {
      %c8_i32_155 = arith.constant 8 : i32
      %221 = arith.addi %c3_i32_86, %c8_i32_155 : i32
      %222 = arith.addi %0, %221 : i32
      %223 = arith.index_cast %222 : i32 to index
      %224 = memref.load %arg1[%223] : memref<16xi32, #tpu.memory_space<smem>>
      %c0_i32_156 = arith.constant 0 : i32
      %c63_i32_157 = arith.constant 63 : i32
      %225 = arith.maxsi %c0_i32_156, %224 : i32
      %226 = arith.minsi %c63_i32_157, %225 : i32
      %c8_i32_158 = arith.constant 8 : i32
      %c0_i32_159 = arith.constant 0 : i32
      %227 = arith.cmpi eq, %c8_i32_158, %c0_i32_159 : i32
      %c1_i32_160 = arith.constant 1 : i32
      %228 = arith.select %227, %c1_i32_160, %c8_i32_158 : i32
      %229 = arith.remsi %221, %228 : i32
      %c0_i32_161 = arith.constant 0 : i32
      %230 = arith.cmpi ne, %229, %c0_i32_161 : i32
      %c0_i32_162 = arith.constant 0 : i32
      %231 = arith.cmpi slt, %229, %c0_i32_162 : i32
      %c0_i32_163 = arith.constant 0 : i32
      %232 = arith.cmpi slt, %228, %c0_i32_163 : i32
      %233 = arith.xori %231, %232 : i1
      %234 = arith.andi %233, %230 : i1
      %235 = arith.addi %229, %228 : i32
      %236 = arith.select %234, %235, %229 : i32
      %c0_i32_164 = arith.constant 0 : i32
      %237 = tpu.memref_slice %arg2[%226, %c0_i32_164] : memref<64x128xf32, #tpu.memory_space<any>> -> memref<1x128xf32, #tpu.memory_space<any>>
      %c0_i32_165 = arith.constant 0 : i32
      %238 = tpu.memref_slice %arg4[%221, %c0_i32_165] : memref<8x128xf32, #tpu.memory_space<vmem>> -> memref<1x128xf32, #tpu.memory_space<vmem>>
      %239 = tpu.memref_slice %arg5[%236] : memref<8x!tpu.dma_semaphore, #tpu.memory_space<semaphore_mem>> -> memref<1x!tpu.dma_semaphore, #tpu.memory_space<semaphore_mem>>
      %240 = tpu.memref_squeeze %239 : memref<1x!tpu.dma_semaphore, #tpu.memory_space<semaphore_mem>> -> memref<!tpu.dma_semaphore, #tpu.memory_space<semaphore_mem>>
      tpu.enqueue_dma source(%237 : memref<1x128xf32, #tpu.memory_space<any>>) target(%238 : memref<1x128xf32, #tpu.memory_space<vmem>>) target_semaphore(%240 : memref<!tpu.dma_semaphore, #tpu.memory_space<semaphore_mem>>)
    } else {
    }
    %c4_i32_99 = arith.constant 4 : i32
    %c8_i32_100 = arith.constant 8 : i32
    %c0_i32_101 = arith.constant 0 : i32
    %145 = arith.cmpi eq, %c8_i32_100, %c0_i32_101 : i32
    %c1_i32_102 = arith.constant 1 : i32
    %146 = arith.select %145, %c1_i32_102, %c8_i32_100 : i32
    %147 = arith.remsi %c4_i32_99, %146 : i32
    %c0_i32_103 = arith.constant 0 : i32
    %148 = arith.cmpi ne, %147, %c0_i32_103 : i32
    %c0_i32_104 = arith.constant 0 : i32
    %149 = arith.cmpi slt, %147, %c0_i32_104 : i32
    %c0_i32_105 = arith.constant 0 : i32
    %150 = arith.cmpi slt, %146, %c0_i32_105 : i32
    %151 = arith.xori %149, %150 : i1
    %152 = arith.andi %151, %148 : i1
    %153 = arith.addi %147, %146 : i32
    %154 = arith.select %152, %153, %147 : i32
    %c0_i32_106 = arith.constant 0 : i32
    %c0_i32_107 = arith.constant 0 : i32
    %155 = tpu.memref_slice %arg2[%c0_i32_106, %c0_i32_107] : memref<64x128xf32, #tpu.memory_space<any>> -> memref<1x128xf32, #tpu.memory_space<any>>
    %c0_i32_108 = arith.constant 0 : i32
    %156 = tpu.memref_slice %arg4[%c4_i32_99, %c0_i32_108] : memref<8x128xf32, #tpu.memory_space<vmem>> -> memref<1x128xf32, #tpu.memory_space<vmem>>
    %157 = tpu.memref_slice %arg5[%154] : memref<8x!tpu.dma_semaphore, #tpu.memory_space<semaphore_mem>> -> memref<1x!tpu.dma_semaphore, #tpu.memory_space<semaphore_mem>>
    %158 = tpu.memref_squeeze %157 : memref<1x!tpu.dma_semaphore, #tpu.memory_space<semaphore_mem>> -> memref<!tpu.dma_semaphore, #tpu.memory_space<semaphore_mem>>
    tpu.wait_dma2 semaphore(%158 : memref<!tpu.dma_semaphore, #tpu.memory_space<semaphore_mem>>) src(%155 : memref<1x128xf32, #tpu.memory_space<any>>) dst(%156 : memref<1x128xf32, #tpu.memory_space<vmem>>)
    %c8_i32_109 = arith.constant 8 : i32
    %159 = arith.addi %c4_i32_99, %c8_i32_109 : i32
    %c8_i32_110 = arith.constant 8 : i32
    %160 = arith.cmpi slt, %159, %c8_i32_110 : i32
    %161 = arith.extui %160 : i1 to i32
    %c0_i32_111 = arith.constant 0 : i32
    %162 = arith.cmpi ne, %161, %c0_i32_111 : i32
    scf.if %162 {
      %c8_i32_155 = arith.constant 8 : i32
      %221 = arith.addi %c4_i32_99, %c8_i32_155 : i32
      %222 = arith.addi %0, %221 : i32
      %223 = arith.index_cast %222 : i32 to index
      %224 = memref.load %arg1[%223] : memref<16xi32, #tpu.memory_space<smem>>
      %c0_i32_156 = arith.constant 0 : i32
      %c63_i32_157 = arith.constant 63 : i32
      %225 = arith.maxsi %c0_i32_156, %224 : i32
      %226 = arith.minsi %c63_i32_157, %225 : i32
      %c8_i32_158 = arith.constant 8 : i32
      %c0_i32_159 = arith.constant 0 : i32
      %227 = arith.cmpi eq, %c8_i32_158, %c0_i32_159 : i32
      %c1_i32_160 = arith.constant 1 : i32
      %228 = arith.select %227, %c1_i32_160, %c8_i32_158 : i32
      %229 = arith.remsi %221, %228 : i32
      %c0_i32_161 = arith.constant 0 : i32
      %230 = arith.cmpi ne, %229, %c0_i32_161 : i32
      %c0_i32_162 = arith.constant 0 : i32
      %231 = arith.cmpi slt, %229, %c0_i32_162 : i32
      %c0_i32_163 = arith.constant 0 : i32
      %232 = arith.cmpi slt, %228, %c0_i32_163 : i32
      %233 = arith.xori %231, %232 : i1
      %234 = arith.andi %233, %230 : i1
      %235 = arith.addi %229, %228 : i32
      %236 = arith.select %234, %235, %229 : i32
      %c0_i32_164 = arith.constant 0 : i32
      %237 = tpu.memref_slice %arg2[%226, %c0_i32_164] : memref<64x128xf32, #tpu.memory_space<any>> -> memref<1x128xf32, #tpu.memory_space<any>>
      %c0_i32_165 = arith.constant 0 : i32
      %238 = tpu.memref_slice %arg4[%221, %c0_i32_165] : memref<8x128xf32, #tpu.memory_space<vmem>> -> memref<1x128xf32, #tpu.memory_space<vmem>>
      %239 = tpu.memref_slice %arg5[%236] : memref<8x!tpu.dma_semaphore, #tpu.memory_space<semaphore_mem>> -> memref<1x!tpu.dma_semaphore, #tpu.memory_space<semaphore_mem>>
      %240 = tpu.memref_squeeze %239 : memref<1x!tpu.dma_semaphore, #tpu.memory_space<semaphore_mem>> -> memref<!tpu.dma_semaphore, #tpu.memory_space<semaphore_mem>>
      tpu.enqueue_dma source(%237 : memref<1x128xf32, #tpu.memory_space<any>>) target(%238 : memref<1x128xf32, #tpu.memory_space<vmem>>) target_semaphore(%240 : memref<!tpu.dma_semaphore, #tpu.memory_space<semaphore_mem>>)
    } else {
    }
    %c5_i32_112 = arith.constant 5 : i32
    %c8_i32_113 = arith.constant 8 : i32
    %c0_i32_114 = arith.constant 0 : i32
    %163 = arith.cmpi eq, %c8_i32_113, %c0_i32_114 : i32
    %c1_i32_115 = arith.constant 1 : i32
    %164 = arith.select %163, %c1_i32_115, %c8_i32_113 : i32
    %165 = arith.remsi %c5_i32_112, %164 : i32
    %c0_i32_116 = arith.constant 0 : i32
    %166 = arith.cmpi ne, %165, %c0_i32_116 : i32
    %c0_i32_117 = arith.constant 0 : i32
    %167 = arith.cmpi slt, %165, %c0_i32_117 : i32
    %c0_i32_118 = arith.constant 0 : i32
    %168 = arith.cmpi slt, %164, %c0_i32_118 : i32
    %169 = arith.xori %167, %168 : i1
    %170 = arith.andi %169, %166 : i1
    %171 = arith.addi %165, %164 : i32
    %172 = arith.select %170, %171, %165 : i32
    %c0_i32_119 = arith.constant 0 : i32
    %c0_i32_120 = arith.constant 0 : i32
    %173 = tpu.memref_slice %arg2[%c0_i32_119, %c0_i32_120] : memref<64x128xf32, #tpu.memory_space<any>> -> memref<1x128xf32, #tpu.memory_space<any>>
    %c0_i32_121 = arith.constant 0 : i32
    %174 = tpu.memref_slice %arg4[%c5_i32_112, %c0_i32_121] : memref<8x128xf32, #tpu.memory_space<vmem>> -> memref<1x128xf32, #tpu.memory_space<vmem>>
    %175 = tpu.memref_slice %arg5[%172] : memref<8x!tpu.dma_semaphore, #tpu.memory_space<semaphore_mem>> -> memref<1x!tpu.dma_semaphore, #tpu.memory_space<semaphore_mem>>
    %176 = tpu.memref_squeeze %175 : memref<1x!tpu.dma_semaphore, #tpu.memory_space<semaphore_mem>> -> memref<!tpu.dma_semaphore, #tpu.memory_space<semaphore_mem>>
    tpu.wait_dma2 semaphore(%176 : memref<!tpu.dma_semaphore, #tpu.memory_space<semaphore_mem>>) src(%173 : memref<1x128xf32, #tpu.memory_space<any>>) dst(%174 : memref<1x128xf32, #tpu.memory_space<vmem>>)
    %c8_i32_122 = arith.constant 8 : i32
    %177 = arith.addi %c5_i32_112, %c8_i32_122 : i32
    %c8_i32_123 = arith.constant 8 : i32
    %178 = arith.cmpi slt, %177, %c8_i32_123 : i32
    %179 = arith.extui %178 : i1 to i32
    %c0_i32_124 = arith.constant 0 : i32
    %180 = arith.cmpi ne, %179, %c0_i32_124 : i32
    scf.if %180 {
      %c8_i32_155 = arith.constant 8 : i32
      %221 = arith.addi %c5_i32_112, %c8_i32_155 : i32
      %222 = arith.addi %0, %221 : i32
      %223 = arith.index_cast %222 : i32 to index
      %224 = memref.load %arg1[%223] : memref<16xi32, #tpu.memory_space<smem>>
      %c0_i32_156 = arith.constant 0 : i32
      %c63_i32_157 = arith.constant 63 : i32
      %225 = arith.maxsi %c0_i32_156, %224 : i32
      %226 = arith.minsi %c63_i32_157, %225 : i32
      %c8_i32_158 = arith.constant 8 : i32
      %c0_i32_159 = arith.constant 0 : i32
      %227 = arith.cmpi eq, %c8_i32_158, %c0_i32_159 : i32
      %c1_i32_160 = arith.constant 1 : i32
      %228 = arith.select %227, %c1_i32_160, %c8_i32_158 : i32
      %229 = arith.remsi %221, %228 : i32
      %c0_i32_161 = arith.constant 0 : i32
      %230 = arith.cmpi ne, %229, %c0_i32_161 : i32
      %c0_i32_162 = arith.constant 0 : i32
      %231 = arith.cmpi slt, %229, %c0_i32_162 : i32
      %c0_i32_163 = arith.constant 0 : i32
      %232 = arith.cmpi slt, %228, %c0_i32_163 : i32
      %233 = arith.xori %231, %232 : i1
      %234 = arith.andi %233, %230 : i1
      %235 = arith.addi %229, %228 : i32
      %236 = arith.select %234, %235, %229 : i32
      %c0_i32_164 = arith.constant 0 : i32
      %237 = tpu.memref_slice %arg2[%226, %c0_i32_164] : memref<64x128xf32, #tpu.memory_space<any>> -> memref<1x128xf32, #tpu.memory_space<any>>
      %c0_i32_165 = arith.constant 0 : i32
      %238 = tpu.memref_slice %arg4[%221, %c0_i32_165] : memref<8x128xf32, #tpu.memory_space<vmem>> -> memref<1x128xf32, #tpu.memory_space<vmem>>
      %239 = tpu.memref_slice %arg5[%236] : memref<8x!tpu.dma_semaphore, #tpu.memory_space<semaphore_mem>> -> memref<1x!tpu.dma_semaphore, #tpu.memory_space<semaphore_mem>>
      %240 = tpu.memref_squeeze %239 : memref<1x!tpu.dma_semaphore, #tpu.memory_space<semaphore_mem>> -> memref<!tpu.dma_semaphore, #tpu.memory_space<semaphore_mem>>
      tpu.enqueue_dma source(%237 : memref<1x128xf32, #tpu.memory_space<any>>) target(%238 : memref<1x128xf32, #tpu.memory_space<vmem>>) target_semaphore(%240 : memref<!tpu.dma_semaphore, #tpu.memory_space<semaphore_mem>>)
    } else {
    }
    %c6_i32_125 = arith.constant 6 : i32
    %c8_i32_126 = arith.constant 8 : i32
    %c0_i32_127 = arith.constant 0 : i32
    %181 = arith.cmpi eq, %c8_i32_126, %c0_i32_127 : i32
    %c1_i32_128 = arith.constant 1 : i32
    %182 = arith.select %181, %c1_i32_128, %c8_i32_126 : i32
    %183 = arith.remsi %c6_i32_125, %182 : i32
    %c0_i32_129 = arith.constant 0 : i32
    %184 = arith.cmpi ne, %183, %c0_i32_129 : i32
    %c0_i32_130 = arith.constant 0 : i32
    %185 = arith.cmpi slt, %183, %c0_i32_130 : i32
    %c0_i32_131 = arith.constant 0 : i32
    %186 = arith.cmpi slt, %182, %c0_i32_131 : i32
    %187 = arith.xori %185, %186 : i1
    %188 = arith.andi %187, %184 : i1
    %189 = arith.addi %183, %182 : i32
    %190 = arith.select %188, %189, %183 : i32
    %c0_i32_132 = arith.constant 0 : i32
    %c0_i32_133 = arith.constant 0 : i32
    %191 = tpu.memref_slice %arg2[%c0_i32_132, %c0_i32_133] : memref<64x128xf32, #tpu.memory_space<any>> -> memref<1x128xf32, #tpu.memory_space<any>>
    %c0_i32_134 = arith.constant 0 : i32
    %192 = tpu.memref_slice %arg4[%c6_i32_125, %c0_i32_134] : memref<8x128xf32, #tpu.memory_space<vmem>> -> memref<1x128xf32, #tpu.memory_space<vmem>>
    %193 = tpu.memref_slice %arg5[%190] : memref<8x!tpu.dma_semaphore, #tpu.memory_space<semaphore_mem>> -> memref<1x!tpu.dma_semaphore, #tpu.memory_space<semaphore_mem>>
    %194 = tpu.memref_squeeze %193 : memref<1x!tpu.dma_semaphore, #tpu.memory_space<semaphore_mem>> -> memref<!tpu.dma_semaphore, #tpu.memory_space<semaphore_mem>>
    tpu.wait_dma2 semaphore(%194 : memref<!tpu.dma_semaphore, #tpu.memory_space<semaphore_mem>>) src(%191 : memref<1x128xf32, #tpu.memory_space<any>>) dst(%192 : memref<1x128xf32, #tpu.memory_space<vmem>>)
    %c8_i32_135 = arith.constant 8 : i32
    %195 = arith.addi %c6_i32_125, %c8_i32_135 : i32
    %c8_i32_136 = arith.constant 8 : i32
    %196 = arith.cmpi slt, %195, %c8_i32_136 : i32
    %197 = arith.extui %196 : i1 to i32
    %c0_i32_137 = arith.constant 0 : i32
    %198 = arith.cmpi ne, %197, %c0_i32_137 : i32
    scf.if %198 {
      %c8_i32_155 = arith.constant 8 : i32
      %221 = arith.addi %c6_i32_125, %c8_i32_155 : i32
      %222 = arith.addi %0, %221 : i32
      %223 = arith.index_cast %222 : i32 to index
      %224 = memref.load %arg1[%223] : memref<16xi32, #tpu.memory_space<smem>>
      %c0_i32_156 = arith.constant 0 : i32
      %c63_i32_157 = arith.constant 63 : i32
      %225 = arith.maxsi %c0_i32_156, %224 : i32
      %226 = arith.minsi %c63_i32_157, %225 : i32
      %c8_i32_158 = arith.constant 8 : i32
      %c0_i32_159 = arith.constant 0 : i32
      %227 = arith.cmpi eq, %c8_i32_158, %c0_i32_159 : i32
      %c1_i32_160 = arith.constant 1 : i32
      %228 = arith.select %227, %c1_i32_160, %c8_i32_158 : i32
      %229 = arith.remsi %221, %228 : i32
      %c0_i32_161 = arith.constant 0 : i32
      %230 = arith.cmpi ne, %229, %c0_i32_161 : i32
      %c0_i32_162 = arith.constant 0 : i32
      %231 = arith.cmpi slt, %229, %c0_i32_162 : i32
      %c0_i32_163 = arith.constant 0 : i32
      %232 = arith.cmpi slt, %228, %c0_i32_163 : i32
      %233 = arith.xori %231, %232 : i1
      %234 = arith.andi %233, %230 : i1
      %235 = arith.addi %229, %228 : i32
      %236 = arith.select %234, %235, %229 : i32
      %c0_i32_164 = arith.constant 0 : i32
      %237 = tpu.memref_slice %arg2[%226, %c0_i32_164] : memref<64x128xf32, #tpu.memory_space<any>> -> memref<1x128xf32, #tpu.memory_space<any>>
      %c0_i32_165 = arith.constant 0 : i32
      %238 = tpu.memref_slice %arg4[%221, %c0_i32_165] : memref<8x128xf32, #tpu.memory_space<vmem>> -> memref<1x128xf32, #tpu.memory_space<vmem>>
      %239 = tpu.memref_slice %arg5[%236] : memref<8x!tpu.dma_semaphore, #tpu.memory_space<semaphore_mem>> -> memref<1x!tpu.dma_semaphore, #tpu.memory_space<semaphore_mem>>
      %240 = tpu.memref_squeeze %239 : memref<1x!tpu.dma_semaphore, #tpu.memory_space<semaphore_mem>> -> memref<!tpu.dma_semaphore, #tpu.memory_space<semaphore_mem>>
      tpu.enqueue_dma source(%237 : memref<1x128xf32, #tpu.memory_space<any>>) target(%238 : memref<1x128xf32, #tpu.memory_space<vmem>>) target_semaphore(%240 : memref<!tpu.dma_semaphore, #tpu.memory_space<semaphore_mem>>)
    } else {
    }
    %c7_i32_138 = arith.constant 7 : i32
    %c8_i32_139 = arith.constant 8 : i32
    %c0_i32_140 = arith.constant 0 : i32
    %199 = arith.cmpi eq, %c8_i32_139, %c0_i32_140 : i32
    %c1_i32_141 = arith.constant 1 : i32
    %200 = arith.select %199, %c1_i32_141, %c8_i32_139 : i32
    %201 = arith.remsi %c7_i32_138, %200 : i32
    %c0_i32_142 = arith.constant 0 : i32
    %202 = arith.cmpi ne, %201, %c0_i32_142 : i32
    %c0_i32_143 = arith.constant 0 : i32
    %203 = arith.cmpi slt, %201, %c0_i32_143 : i32
    %c0_i32_144 = arith.constant 0 : i32
    %204 = arith.cmpi slt, %200, %c0_i32_144 : i32
    %205 = arith.xori %203, %204 : i1
    %206 = arith.andi %205, %202 : i1
    %207 = arith.addi %201, %200 : i32
    %208 = arith.select %206, %207, %201 : i32
    %c0_i32_145 = arith.constant 0 : i32
    %c0_i32_146 = arith.constant 0 : i32
    %209 = tpu.memref_slice %arg2[%c0_i32_145, %c0_i32_146] : memref<64x128xf32, #tpu.memory_space<any>> -> memref<1x128xf32, #tpu.memory_space<any>>
    %c0_i32_147 = arith.constant 0 : i32
    %210 = tpu.memref_slice %arg4[%c7_i32_138, %c0_i32_147] : memref<8x128xf32, #tpu.memory_space<vmem>> -> memref<1x128xf32, #tpu.memory_space<vmem>>
    %211 = tpu.memref_slice %arg5[%208] : memref<8x!tpu.dma_semaphore, #tpu.memory_space<semaphore_mem>> -> memref<1x!tpu.dma_semaphore, #tpu.memory_space<semaphore_mem>>
    %212 = tpu.memref_squeeze %211 : memref<1x!tpu.dma_semaphore, #tpu.memory_space<semaphore_mem>> -> memref<!tpu.dma_semaphore, #tpu.memory_space<semaphore_mem>>
    tpu.wait_dma2 semaphore(%212 : memref<!tpu.dma_semaphore, #tpu.memory_space<semaphore_mem>>) src(%209 : memref<1x128xf32, #tpu.memory_space<any>>) dst(%210 : memref<1x128xf32, #tpu.memory_space<vmem>>)
    %c8_i32_148 = arith.constant 8 : i32
    %213 = arith.addi %c7_i32_138, %c8_i32_148 : i32
    %c8_i32_149 = arith.constant 8 : i32
    %214 = arith.cmpi slt, %213, %c8_i32_149 : i32
    %215 = arith.extui %214 : i1 to i32
    %c0_i32_150 = arith.constant 0 : i32
    %216 = arith.cmpi ne, %215, %c0_i32_150 : i32
    scf.if %216 {
      %c8_i32_155 = arith.constant 8 : i32
      %221 = arith.addi %c7_i32_138, %c8_i32_155 : i32
      %222 = arith.addi %0, %221 : i32
      %223 = arith.index_cast %222 : i32 to index
      %224 = memref.load %arg1[%223] : memref<16xi32, #tpu.memory_space<smem>>
      %c0_i32_156 = arith.constant 0 : i32
      %c63_i32_157 = arith.constant 63 : i32
      %225 = arith.maxsi %c0_i32_156, %224 : i32
      %226 = arith.minsi %c63_i32_157, %225 : i32
      %c8_i32_158 = arith.constant 8 : i32
      %c0_i32_159 = arith.constant 0 : i32
      %227 = arith.cmpi eq, %c8_i32_158, %c0_i32_159 : i32
      %c1_i32_160 = arith.constant 1 : i32
      %228 = arith.select %227, %c1_i32_160, %c8_i32_158 : i32
      %229 = arith.remsi %221, %228 : i32
      %c0_i32_161 = arith.constant 0 : i32
      %230 = arith.cmpi ne, %229, %c0_i32_161 : i32
      %c0_i32_162 = arith.constant 0 : i32
      %231 = arith.cmpi slt, %229, %c0_i32_162 : i32
      %c0_i32_163 = arith.constant 0 : i32
      %232 = arith.cmpi slt, %228, %c0_i32_163 : i32
      %233 = arith.xori %231, %232 : i1
      %234 = arith.andi %233, %230 : i1
      %235 = arith.addi %229, %228 : i32
      %236 = arith.select %234, %235, %229 : i32
      %c0_i32_164 = arith.constant 0 : i32
      %237 = tpu.memref_slice %arg2[%226, %c0_i32_164] : memref<64x128xf32, #tpu.memory_space<any>> -> memref<1x128xf32, #tpu.memory_space<any>>
      %c0_i32_165 = arith.constant 0 : i32
      %238 = tpu.memref_slice %arg4[%221, %c0_i32_165] : memref<8x128xf32, #tpu.memory_space<vmem>> -> memref<1x128xf32, #tpu.memory_space<vmem>>
      %239 = tpu.memref_slice %arg5[%236] : memref<8x!tpu.dma_semaphore, #tpu.memory_space<semaphore_mem>> -> memref<1x!tpu.dma_semaphore, #tpu.memory_space<semaphore_mem>>
      %240 = tpu.memref_squeeze %239 : memref<1x!tpu.dma_semaphore, #tpu.memory_space<semaphore_mem>> -> memref<!tpu.dma_semaphore, #tpu.memory_space<semaphore_mem>>
      tpu.enqueue_dma source(%237 : memref<1x128xf32, #tpu.memory_space<any>>) target(%238 : memref<1x128xf32, #tpu.memory_space<vmem>>) target_semaphore(%240 : memref<!tpu.dma_semaphore, #tpu.memory_space<semaphore_mem>>)
    } else {
    }
    %c8_i32_151 = arith.constant 8 : i32
    %c0 = arith.constant 0 : index
    %c0_152 = arith.constant 0 : index
    %217 = vector.load %arg4[%c0, %c0_152] : memref<8x128xf32, #tpu.memory_space<vmem>>, vector<8x128xf32>
    %cst = arith.constant 11.3137083 : f32
    %218 = vector.broadcast %cst : f32 to vector<8x128xf32>
    %219 = arith.mulf %217, %218 : vector<8x128xf32>
    %c0_153 = arith.constant 0 : index
    %c0_154 = arith.constant 0 : index
    %220 = vector.load %arg3[%c0_153, %c0_154] : memref<8x128xf32, #tpu.memory_space<vmem>>, vector<8x128xf32>
    tpu.vector_store %arg3[%c0_153, %c0_154], %219 {strides = array<i32>} : memref<8x128xf32, #tpu.memory_space<vmem>>, vector<8x128xf32>,
    return
  }
  func.func @transform_1(%arg0: i32, %arg1: memref<16xi32, #tpu.memory_space<smem>>) -> (i32, i32) {
    %c0_i32 = arith.constant 0 : i32
    %c0_i32_0 = arith.constant 0 : i32
    return %arg0, %c0_i32 : i32, i32
  }
}

</mosaic_0001>

<bundles_post_ra>
// kernel: tpu_custom_call.1
= control target key start
LH: loop header
LB: loop body
LE: loop exit
PB: predicated region body
PF: predicated region fallthrough
CT: control target
= control target key end

     0   :  { %s1049_s0 = inlined_call_operand.hbm [shape: s32[16], index: 0, kind: input, shape index: {}]   ;;  %s1050_s1 = inlined_call_operand.hbm [shape: f32[64,128], index: 1, kind: input, shape index: {}]   ;;  %s1051_s2 = inlined_call_operand.hbm [shape: f32[16,128], index: 2, kind: output, shape index: {}]  }
   0x1   :  { %s487_s11 = scalar_lea.hbm %s1049_s0, 16 }
   0x2   :  { %p488_p0 = scmp.ne.s32.totalorder %s1049_s0, %s487_s11  ;;  %p491_p1 = scmp.lt.u32.totalorder %s487_s11, %s1049_s0 }
   0x4   :  { %p493_p2 = pnand %p491_p1, %p488_p0 }
   0x6   :  { %496 = shalt.err (!%p493_p2)  }
   0x7   :  { %s763_s16 = smov [#allocation5]  }
   0x8   :  { %8 = dma.hbm_to_smem %s1049_s0, 16, %s763_s16, [#allocation4] }
   0x9   :  { %729 = dma.done.wait [#allocation4], 16 }
   0xa   :  { %730 = vsyncadd [#allocation4], 4294967280 }
   0xb   :  { %10 = sfence }
   0xc   :  { %11 = vsyncpa [#allocation7], 0 }
   0xd   :  { %13 = vsyncpa [#allocation7 + $0x1], 0  ;;  %s800_s19 = smov 0   ;;  %s802_s20 = smov 0  }
   0xe   :  { %s804_s21 = smov 0  }
   0xf LB: > { %s366_s0 = sadd.s32 4294967295, %s761_s21   ;;  %s817_s22 = sadd.s32 1, %s761_s21   ;;  %s761_s21 = sphi %s804_s21, %s1065_s21   ;;  %s757_s20 = sphi %s802_s20, %s1064_s20   ;;  %s753_s19 = sphi %s800_s19, %s1063_s19  }
  0x10   : > { %s22_s23 = ssub.s32 %s761_s21, %s817_s22  ;;  %s25_s24 = sadd.s32 1, %s757_s20 }
  0x11   : > { %p23_p3 = scmp.eq.s32.totalorder %s22_s23, 0  ;;  %p367_p4 = scmp.ne.s32.totalorder %s22_s23, 0 }
  0x12   : > { %p29_p5 = scmp.eq.s32.totalorder %s761_s21, 1  ;;  %p34_p6 = scmp.ne.s32.totalorder %s757_s20, %s753_s19 }
  0x13   : > { %s826_s25 = scalar_select %p23_p3, %s757_s20, %s25_s24  }
  0x14   : > { %p828_p7 = por %p367_p4, %p29_p5  ;;  %p35_p8 = scmp.eq.s32.totalorder %s366_s0, 1 }
  0x15   : > { %p368_p10 = scmp.ge.s32.totalorder %s761_s21, 2 }
  0x16   : > { %s1053_s26 = scalar_select %p828_p7, 1, 0 }
  0x17   : > { %p832_p9 = por %p35_p8, %p34_p6  ;;  %44 = sbr.rel (%p368_p10) target bundleno = 276 (0x114), region = 12 }
  0x18   : > { %s49_s28 = sand.u32 (!%p368_p10), 1, %s757_s20   ;;  %s839_s29 = sshll.u32 (!%p368_p10), %s761_s21, 3 }
  0x19   : > { %s1054_s27 = scalar_select %p832_p9, 1, 0 }
  0x1a   : > { %s843_s30 = sshll.u32 (!%p368_p10), %s49_s28, 3  ;;  %s53_s3 = sld [smem:[#allocation5 + %s839_s29]] (!%p368_p10) }
  0x1b   : > { %s764_s4 = smov (!%p368_p10), [#allocation2]   ;;  %s71_s6 = sadd.s32 (!%p368_p10), 1, %s839_s29 }
  0x1c   : > { %s67_s5 = sshll.u32 (!%p368_p10), %s764_s4, 4  ;;  %s849_s7 = sld [smem:[#allocation5 + %s71_s6]] (!%p368_p10)  ;;  %s847_s5 = int_to_ptr.vmem [resolvable:$true] %s67_s5 }
  0x1d   : > { %s92_s8 = sadd.s32 (!%p368_p10), 2, %s839_s29  ;;  %s765_s9 = smov (!%p368_p10), [#allocation2 + $0x1]  }
  0x1e   : > { %s88_s10 = sshll.u32 %s765_s9, 4  ;;  %s852_s11 = sld [smem:[#allocation5 + %s92_s8]]  ;;  %s854_s10 = int_to_ptr.vmem [resolvable:$true] %s88_s10 }
  0x1f   : > { %s867_s23 = scalar_lea.hbm %s1050_s1, 1024 }
  0x20   : > { %p54_p11 = scmp.gt.s32.totalorder %s53_s3, 0  ;;  %p371_p12 = scmp.lt.s32.totalorder %s53_s3, 63 }
  0x22   : > { %s1067_s3 = smov (!%p54_p11, %s53_s3), 0  ;;  %p73_p13 = scmp.gt.s32.totalorder %s849_s7, 0 }
  0x23   : > { %s1069_s3 = smov (!%p371_p12, %s1067_s3), 63 }
  0x24   : > { %s74_s12 = scalar_select %p73_p13, %s849_s7, 0 }
  0x25   : > { %s376_s13 = sshll.u32 %s1069_s3, 4 }
  0x26   : > { %s59_s16 = scalar_lea.hbm %s1050_s1, %s376_s13 }
  0x27   : > { %s497_s17 = scalar_lea.hbm %s59_s16, 16  ;;  %p500_p4 = scmp.lt.u32.totalorder %s59_s16, %s1050_s1 }
  0x28   : > { %p498_p3 = scmp.ne.s32.totalorder %s59_s16, %s497_s17  ;;  %p501_p5 = scmp.lt.u32.totalorder %s867_s23, %s497_s17 }
  0x29   : > { %p503_p8 = scmp.lt.u32.totalorder %s497_s17, %s59_s16 }
  0x2a   : > { %p502_p6 = por %p501_p5, %p500_p4 }
  0x2c   : > { %p504_p10 = por %p503_p8, %p502_p6 }
  0x2e   : > { %p505_p11 = pnand %p504_p10, %p498_p3 }
  0x30   : > { %508 = shalt.err (!%p505_p11)  }
  0x31   : > { %s509_s3 = scalar_lea.vmem %s847_s5, 16  ;;  %s876_s6 = scalar_lea.vmem %s847_s5, 128 }
  0x32   : > { %p510_p12 = scmp.ne.s32.totalorder %s847_s5, %s509_s3  ;;  %p514_p13 = scmp.lt.s32.totalorder %s847_s5, %s847_s5 }
  0x33   : > { %p515_p2 = scmp.lt.s32.totalorder %s876_s6, %s509_s3 }
  0x35   : > { %p516_p1 = por %p515_p2, %p514_p13 }
  0x37   : > { %p517_p0 = pnand %p516_p1, %p510_p12 }
  0x39   : > { %520 = shalt.err (!%p517_p0)  }
  0x3a   : > { %70 = dma.hbm_to_vmem [thread:$0]  %s59_s16, 16, %s847_s5, [#allocation3] }
  0x3b   : > { %p1055_p3 = scmp.lt.s32.totalorder %s849_s7, 63  ;;  %p1056_p4 = scmp.gt.s32.totalorder %s852_s11, 0 }
  0x3c   : > { %s766_s13 = smov [#allocation2 + $0x2]  }
  0x3d   : > { %s1071_s12 = smov (!%p1055_p3, %s74_s12), 63  ;;  %s109_s14 = sshll.u32 %s766_s13, 4  ;;  %s890_s14 = int_to_ptr.vmem [resolvable:$true] %s109_s14 }
  0x3e   : > { %s95_s8 = scalar_select %p1056_p4, %s852_s11, 0 }
  0x3f   : > { %s382_s9 = sshll.u32 %s1071_s12, 4 }
  0x40   : > { %s78_s18 = scalar_lea.hbm %s1050_s1, %s382_s9 }
  0x41   : > { %s521_s0 = scalar_lea.hbm %s78_s18, 16  ;;  %p524_p1 = scmp.lt.u32.totalorder %s78_s18, %s1050_s1 }
  0x42   : > { %p522_p0 = scmp.ne.s32.totalorder %s78_s18, %s521_s0  ;;  %p525_p2 = scmp.lt.u32.totalorder %s867_s23, %s521_s0 }
  0x43   : > { %p527_p6 = scmp.lt.u32.totalorder %s521_s0, %s78_s18 }
  0x44   : > { %p526_p5 = por %p525_p2, %p524_p1 }
  0x46   : > { %p528_p8 = por %p527_p6, %p526_p5 }
  0x48   : > { %p529_p10 = pnand %p528_p8, %p522_p0 }
  0x4a   : > { %532 = shalt.err (!%p529_p10)  }
  0x4b   : > { %s533_s7 = scalar_lea.vmem %s854_s10, 16  ;;  %p538_p12 = scmp.lt.s32.totalorder %s854_s10, %s847_s5 }
  0x4c   : > { %p534_p11 = scmp.ne.s32.totalorder %s854_s10, %s533_s7  ;;  %p539_p13 = scmp.lt.s32.totalorder %s876_s6, %s533_s7 }
  0x4e   : > { %p540_p3 = por %p539_p13, %p538_p12 }
  0x50   : > { %p541_p4 = pnand %p540_p3, %p534_p11 }
  0x52   : > { %544 = shalt.err (!%p541_p4)  }
  0x53   : > { %91 = dma.hbm_to_vmem [thread:$0]  %s78_s18, 16, %s854_s10, [#allocation3 + $0x1] }
  0x54   : > { %p1057_p1 = scmp.lt.s32.totalorder %s852_s11, 63  ;;  %s113_s12 = sadd.s32 3, %s839_s29 }
  0x55   : > { %s905_s3 = sld [smem:[#allocation5 + %s113_s12]] }
  0x56   : > { %s1073_s8 = smov (!%p1057_p1, %s95_s8), 63 }
  0x57   : > { %s388_s16 = sshll.u32 %s1073_s8, 4 }
  0x58   : > { %s99_s15 = scalar_lea.hbm %s1050_s1, %s388_s16 }
  0x59   : > { %s545_s17 = scalar_lea.hbm %s99_s15, 16  ;;  %p548_p2 = scmp.lt.u32.totalorder %s99_s15, %s1050_s1 }
  0x5a   : > { %p546_p0 = scmp.ne.s32.totalorder %s99_s15, %s545_s17  ;;  %p549_p5 = scmp.lt.u32.totalorder %s867_s23, %s545_s17 }
  0x5b   : > { %p551_p8 = scmp.lt.u32.totalorder %s545_s17, %s99_s15 }
  0x5c   : > { %p550_p6 = por %p549_p5, %p548_p2 }
  0x5e   : > { %p552_p10 = por %p551_p8, %p550_p6 }
  0x60   : > { %p553_p11 = pnand %p552_p10, %p546_p0 }
  0x62   : > { %556 = shalt.err (!%p553_p11)  }
  0x63   : > { %s557_s10 = scalar_lea.vmem %s890_s14, 16  ;;  %p562_p13 = scmp.lt.s32.totalorder %s890_s14, %s847_s5 }
  0x64   : > { %p558_p12 = scmp.ne.s32.totalorder %s890_s14, %s557_s10  ;;  %p563_p3 = scmp.lt.s32.totalorder %s876_s6, %s557_s10 }
  0x66   : > { %p564_p4 = por %p563_p3, %p562_p13 }
  0x68   : > { %p565_p1 = pnand %p564_p4, %p558_p12 }
  0x6a   : > { %568 = shalt.err (!%p565_p1)  }
  0x6b   : > { %112 = dma.hbm_to_vmem [thread:$0]  %s99_s15, 16, %s890_s14, [#allocation3 + $0x2] }
  0x6c   : > { %s767_s11 = smov [#allocation2 + $0x3]   ;;  %s134_s18 = sadd.s32 4, %s839_s29 }
  0x6d   : > { %s130_s8 = sshll.u32 %s767_s11, 4  ;;  %s921_s4 = sld [smem:[#allocation5 + %s134_s18]]  ;;  %s131_s8 = int_to_ptr.vmem [resolvable:$true] %s130_s8 }
  0x6e   : > { %s768_s7 = smov [#allocation2 + $0x4]   ;;  %s155_s16 = sadd.s32 5, %s839_s29 }
  0x6f   : > { %s151_s12 = sshll.u32 %s768_s7, 4  ;;  %p115_p0 = scmp.gt.s32.totalorder %s905_s3, 0  ;;  %s929_s12 = int_to_ptr.vmem [resolvable:$true] %s151_s12 }
  0x70   : > { %p389_p2 = scmp.lt.s32.totalorder %s905_s3, 63  ;;  %s926_s9 = sld [smem:[#allocation5 + %s155_s16]] }
  0x71   : > { %s1075_s3 = smov (!%p115_p0, %s905_s3), 0  ;;  %s176_s14 = sadd.s32 6, %s839_s29 }
  0x72   : > { %s1077_s3 = smov (!%p389_p2, %s1075_s3), 63 }
  0x73   : > { %s394_s13 = sshll.u32 %s1077_s3, 4 }
  0x74   : > { %s120_s0 = scalar_lea.hbm %s1050_s1, %s394_s13 }
  0x75   : > { %s569_s24 = scalar_lea.hbm %s120_s0, 16  ;;  %p572_p11 = scmp.lt.u32.totalorder %s120_s0, %s1050_s1 }
  0x76   : > { %p570_p10 = scmp.ne.s32.totalorder %s120_s0, %s569_s24  ;;  %p573_p12 = scmp.lt.u32.totalorder %s867_s23, %s569_s24 }
  0x77   : > { %p575_p3 = scmp.lt.u32.totalorder %s569_s24, %s120_s0 }
  0x78   : > { %p574_p13 = por %p573_p12, %p572_p11 }
  0x7a   : > { %p576_p4 = por %p575_p3, %p574_p13 }
  0x7c   : > { %p577_p1 = pnand %p576_p4, %p570_p10 }
  0x7e   : > { %580 = shalt.err (!%p577_p1)  }
  0x7f   : > { %s581_s18 = scalar_lea.vmem %s131_s8, 16  ;;  %p586_p2 = scmp.lt.s32.totalorder %s131_s8, %s847_s5 }
  0x80   : > { %p582_p0 = scmp.ne.s32.totalorder %s131_s8, %s581_s18  ;;  %p587_p6 = scmp.lt.s32.totalorder %s876_s6, %s581_s18 }
  0x82   : > { %p588_p5 = por %p587_p6, %p586_p2 }
  0x84   : > { %p589_p8 = pnand %p588_p5, %p582_p0 }
  0x86   : > { %592 = shalt.err (!%p589_p8)  }
  0x87   : > { %133 = dma.hbm_to_vmem [thread:$0]  %s120_s0, 16, %s131_s8, [#allocation3 + $0x3] }
  0x88   : > { %p1058_p9 = scmp.gt.s32.totalorder %s921_s4, 0  ;;  %p1059_p10 = scmp.gt.s32.totalorder %s926_s9, 0 }
  0x89   : > { %p1060_p11 = scmp.lt.s32.totalorder %s921_s4, 63  ;;  %p401_p12 = scmp.lt.s32.totalorder %s926_s9, 63 }
  0x8a   : > { %s137_s3 = scalar_select %p1058_p9, %s921_s4, 0 }
  0x8b   : > { %s158_s7 = scalar_select %p1059_p10, %s926_s9, 0 }
  0x8c   : > { %s1079_s3 = smov (!%p1060_p11, %s137_s3), 63  ;;  %s769_s16 = smov [#allocation2 + $0x5]  }
  0x8d   : > { %s172_s13 = sshll.u32 %s769_s16, 4  ;;  %s400_s15 = sshll.u32 %s1079_s3, 4  ;;  %s173_s13 = int_to_ptr.vmem [resolvable:$true] %s172_s13 }
  0x8e   : > { %s953_s17 = sld [smem:[#allocation5 + %s176_s14]]  ;;  %s141_s24 = scalar_lea.hbm %s1050_s1, %s400_s15 }
  0x8f   : > { %s593_s10 = scalar_lea.hbm %s141_s24, 16  ;;  %p596_p9 = scmp.lt.u32.totalorder %s141_s24, %s1050_s1 }
  0x90   : > { %p594_p5 = scmp.ne.s32.totalorder %s141_s24, %s593_s10  ;;  %p597_p6 = scmp.lt.u32.totalorder %s867_s23, %s593_s10 }
  0x91   : > { %p599_p13 = scmp.lt.u32.totalorder %s593_s10, %s141_s24 }
  0x92   : > { %p598_p8 = por %p597_p6, %p596_p9 }
  0x94   : > { %p600_p3 = por %p599_p13, %p598_p8 }
  0x96   : > { %p601_p4 = pnand %p600_p3, %p594_p5 }
  0x98   : > { %604 = shalt.err (!%p601_p4)  }
  0x99   : > { %s605_s4 = scalar_lea.vmem %s929_s12, 16  ;;  %p610_p0 = scmp.lt.s32.totalorder %s929_s12, %s847_s5 }
  0x9a   : > { %p606_p1 = scmp.ne.s32.totalorder %s929_s12, %s605_s4  ;;  %p611_p2 = scmp.lt.s32.totalorder %s876_s6, %s605_s4 }
  0x9c   : > { %p612_p10 = por %p611_p2, %p610_p0 }
  0x9e   : > { %p613_p11 = pnand %p612_p10, %p606_p1 }
  0xa0   : > { %616 = shalt.err (!%p613_p11)  }
  0xa1   : > { %154 = dma.hbm_to_vmem [thread:$0]  %s141_s24, 16, %s929_s12, [#allocation3 + $0x4] }
  0xa2   : > { %s1081_s7 = smov (!%p401_p12, %s158_s7), 63  ;;  %s770_s14 = smov [#allocation2 + $0x6]  }
  0xa3   : > { %s193_s3 = sshll.u32 %s770_s14, 4  ;;  %s406_s16 = sshll.u32 %s1081_s7, 4  ;;  %s194_s3 = int_to_ptr.vmem [resolvable:$true] %s193_s3 }
  0xa4   : > { %s197_s15 = sadd.s32 7, %s839_s29  ;;  %s162_s10 = scalar_lea.hbm %s1050_s1, %s406_s16 }
  0xa5   : > { %p178_p5 = scmp.gt.s32.totalorder %s953_s17, 0  ;;  %s617_s11 = scalar_lea.hbm %s162_s10, 16 }
  0xa6   : > { %p618_p9 = scmp.ne.s32.totalorder %s162_s10, %s617_s11  ;;  %p620_p6 = scmp.lt.u32.totalorder %s162_s10, %s1050_s1 }
  0xa7   : > { %p621_p8 = scmp.lt.u32.totalorder %s867_s23, %s617_s11  ;;  %p623_p3 = scmp.lt.u32.totalorder %s617_s11, %s162_s10 }
  0xa9   : > { %p622_p13 = por %p621_p8, %p620_p6 }
  0xab   : > { %p624_p12 = por %p623_p3, %p622_p13 }
  0xad   : > { %p625_p4 = pnand %p624_p12, %p618_p9 }
  0xaf   : > { %628 = shalt.err (!%p625_p4)  }
  0xb0   : > { %s629_s12 = scalar_lea.vmem %s173_s13, 16  ;;  %p634_p0 = scmp.lt.s32.totalorder %s173_s13, %s847_s5 }
  0xb1   : > { %p630_p1 = scmp.ne.s32.totalorder %s173_s13, %s629_s12  ;;  %p635_p2 = scmp.lt.s32.totalorder %s876_s6, %s629_s12 }
  0xb3   : > { %p636_p10 = por %p635_p2, %p634_p0 }
  0xb5   : > { %p637_p11 = pnand %p636_p10, %p630_p1 }
  0xb7   : > { %640 = shalt.err (!%p637_p11)  }
  0xb8   : > { %175 = dma.hbm_to_vmem [thread:$0]  %s162_s10, 16, %s173_s13, [#allocation3 + $0x5] }
  0xb9   : > { %s179_s29 = scalar_select %p178_p5, %s953_s17, 0 }
  0xba   : > { %p407_p6 = scmp.lt.s32.totalorder %s953_s17, 63  ;;  %s198_s9 = sld [smem:[#allocation5 + %s197_s15]] }
  0xbc   : > { %s1083_s29 = smov (!%p407_p6, %s179_s29), 63 }
  0xbd   : > { %s412_s7 = sshll.u32 %s1083_s29, 4 }
  0xbe   : > { %s183_s16 = scalar_lea.hbm %s1050_s1, %s412_s7 }
  0xbf   : > { %s641_s8 = scalar_lea.hbm %s183_s16, 16  ;;  %p644_p8 = scmp.lt.u32.totalorder %s183_s16, %s1050_s1 }
  0xc0   : > { %p642_p9 = scmp.ne.s32.totalorder %s183_s16, %s641_s8  ;;  %p645_p13 = scmp.lt.u32.totalorder %s867_s23, %s641_s8 }
  0xc1   : > { %p647_p12 = scmp.lt.u32.totalorder %s641_s8, %s183_s16 }
  0xc2   : > { %p646_p3 = por %p645_p13, %p644_p8 }
  0xc4   : > { %p648_p4 = por %p647_p12, %p646_p3 }
  0xc6   : > { %p649_p5 = pnand %p648_p4, %p642_p9 }
  0xc8   : > { %652 = shalt.err (!%p649_p5)  }
  0xc9   : > { %s653_s13 = scalar_lea.vmem %s194_s3, 16  ;;  %p658_p0 = scmp.lt.s32.totalorder %s194_s3, %s847_s5 }
  0xca   : > { %p654_p1 = scmp.ne.s32.totalorder %s194_s3, %s653_s13  ;;  %p659_p2 = scmp.lt.s32.totalorder %s876_s6, %s653_s13 }
  0xcc   : > { %p660_p10 = por %p659_p2, %p658_p0 }
  0xce   : > { %p661_p11 = pnand %p660_p10, %p654_p1 }
  0xd0   : > { %664 = shalt.err (!%p661_p11)  }
  0xd1   : > { %196 = dma.hbm_to_vmem [thread:$0]  %s183_s16, 16, %s194_s3, [#allocation3 + $0x6] }
  0xd2   : > { %p199_p6 = scmp.gt.s32.totalorder %s198_s9, 0  ;;  %p413_p7 = scmp.lt.s32.totalorder %s198_s9, 63 }
  0xd3   : > { %s771_s17 = smov [#allocation2 + $0x7]  }
  0xd4   : > { %s214_s15 = sshll.u32 %s771_s17, 4  ;;  %s1085_s9 = smov (!%p199_p6, %s198_s9), 0  ;;  %s215_s15 = int_to_ptr.vmem [resolvable:$true] %s214_s15 }
  0xd5   : > { %s1087_s9 = smov (!%p413_p7, %s1085_s9), 63 }
  0xd6   : > { %s418_s10 = sshll.u32 %s1087_s9, 4 }
  0xd7   : > { %s204_s12 = scalar_lea.hbm %s1050_s1, %s418_s10 }
  0xd8   : > { %s665_s29 = scalar_lea.hbm %s204_s12, 16  ;;  %p668_p8 = scmp.lt.u32.totalorder %s204_s12, %s1050_s1 }
  0xd9   : > { %p666_p9 = scmp.ne.s32.totalorder %s204_s12, %s665_s29  ;;  %p669_p13 = scmp.lt.u32.totalorder %s867_s23, %s665_s29 }
  0xda   : > { %p671_p12 = scmp.lt.u32.totalorder %s665_s29, %s204_s12 }
  0xdb   : > { %p670_p3 = por %p669_p13, %p668_p8 }
  0xdd   : > { %p672_p4 = por %p671_p12, %p670_p3 }
  0xdf   : > { %p673_p5 = pnand %p672_p4, %p666_p9 }
  0xe1   : > { %676 = shalt.err (!%p673_p5)  }
  0xe2   : > { %s677_s3 = scalar_lea.vmem %s215_s15, 16  ;;  %p682_p1 = scmp.lt.s32.totalorder %s215_s15, %s847_s5 }
  0xe3   : > { %p678_p7 = scmp.ne.s32.totalorder %s215_s15, %s677_s3  ;;  %p683_p0 = scmp.lt.s32.totalorder %s876_s6, %s677_s3 }
  0xe5   : > { %p684_p2 = por %p683_p0, %p682_p1 }
  0xe7   : > { %p685_p10 = pnand %p684_p2, %p678_p7 }
  0xe9   : > { %688 = shalt.err (!%p685_p10)  }
  0xea   : > { %217 = dma.hbm_to_vmem [thread:$0]  %s204_s12, 16, %s215_s15, [#allocation3 + $0x7] }
  0xeb   : > { %s51_s9 = scalar_lea.vmem [#allocation6], %s843_s30 }
  0xec   : > { %731 = dma.done.wait [#allocation3], 16 }
  0xed   : > { %732 = vsyncadd [#allocation3], 4294967280 }
  0xee   : > { %733 = dma.done.wait [#allocation3 + $0x1], 16 }
  0xef   : > { %734 = vsyncadd [#allocation3 + $0x1], 4294967280 }
  0xf0   : > { %735 = dma.done.wait [#allocation3 + $0x2], 16 }
  0xf1   : > { %736 = vsyncadd [#allocation3 + $0x2], 4294967280 }
  0xf2   : > { %737 = dma.done.wait [#allocation3 + $0x3], 16 }
  0xf3   : > { %738 = vsyncadd [#allocation3 + $0x3], 4294967280 }
  0xf4   : > { %739 = dma.done.wait [#allocation3 + $0x4], 16 }
  0xf5   : > { %740 = vsyncadd [#allocation3 + $0x4], 4294967280 }
  0xf6   : > { %741 = dma.done.wait [#allocation3 + $0x5], 16 }
  0xf7   : > { %742 = vsyncadd [#allocation3 + $0x5], 4294967280 }
  0xf8   : > { %743 = dma.done.wait [#allocation3 + $0x6], 16 }
  0xf9   : > { %744 = vsyncadd [#allocation3 + $0x6], 4294967280 }
  0xfa   : > { %745 = dma.done.wait [#allocation3 + $0x7], 16 }
  0xfb   : > { %746 = vsyncadd [#allocation3 + $0x7], 4294967280  ;;  %s420_s30 = sshll.u32 %s761_s21, 7  ;;  %s252_s5 = sshll.u32 %s51_s9, 4  ;;  %v235_v0 = vld [vmem:[#allocation2] sm:$0xff]  ;;  %s1010_s5 = int_to_ptr.vmem [resolvable:$true] %s252_s5 }
  0xfc   : > { %v236_v1 = vmul.f32 11.313708, %v235_v0  ;;  %s1008_s14 = scalar_lea.hbm %s1051_s2, %s420_s30  ;;  %s239_s16 = scalar_lea.sflag [#allocation7], %s49_s28 }
  0xfd   : > { %s689_s8 = scalar_lea.vmem %s1010_s5, 128  ;;  %p1061_p6 = scmp.ne.s32.totalorder %s1053_s26, 0 }
  0xfe   : > { %237 = vst [vmem:[%s51_s9] sm:$0xff] %v236_v1  ;;  %p690_p11 = scmp.ne.s32.totalorder %s1010_s5, %s689_s8  ;;  %s772_s0 = smov [#allocation6]  }
  0xff   : > { %s693_s11 = sshll.u32 %s772_s0, 4  ;;  %s694_s11 = int_to_ptr.vmem [resolvable:$false] %s693_s11 }
 0x100   : > { %p691_p9 = pnand %p690_p11, %p1061_p6  ;;  %s695_s13 = scalar_lea.vmem %s694_s11, 256 }
 0x101   : > { %p696_p13 = scmp.lt.s32.totalorder %s1010_s5, %s694_s11  ;;  %p697_p3 = scmp.lt.s32.totalorder %s695_s13, %s689_s8 }
 0x102   : > { %p692_p8 = pneg %p691_p9 }
 0x103   : > { %p698_p12 = por %p697_p3, %p696_p13 }
 0x105   : > { %p699_p4 = pnand %p698_p12, %p692_p8 }
 0x107   : > { %702 = shalt.err (!%p699_p4)
}
 0x108   : > { %s703_s28 = scalar_lea.hbm %s1008_s14, 128  ;;  %s707_s10 = scalar_lea.hbm %s1051_s2, 256 }
 0x109   : > { %p704_p5 = scmp.ne.s32.totalorder %s1008_s14, %s703_s28  ;;  %p708_p0 = scmp.lt.u32.totalorder %s1008_s14, %s1051_s2 }
 0x10a   : > { %p709_p2 = scmp.lt.u32.totalorder %s707_s10, %s703_s28  ;;  %p711_p11 = scmp.lt.u32.totalorder %s703_s28, %s1008_s14 }
 0x10b   : > { %p705_p7 = pnand %p704_p5, %p1061_p6 }
 0x10c   : > { %p710_p10 = por %p709_p2, %p708_p0 }
 0x10d   : > { %p706_p1 = pneg %p705_p7 }
 0x10e   : > { %p712_p9 = por %p711_p11, %p710_p10 }
 0x110   : > { %p713_p8 = pnand %p712_p9, %p706_p1 }
 0x112   : > { %716 = shalt.err (!%p713_p8)
}
 0x113   : > { %447 = dma.vmem_to_hbm [thread:$0]  (%p1061_p6), %s1010_s5, 128, %s1008_s14, %s239_s16  }
 0x114 PF: > { %p453_p13 = scmp.ge.s32.totalorder %s761_s21, 1  ;;  %s264_s12 = sand.u32 1, %s753_s19  }
 0x115   : > { %p1062_p3 = scmp.ne.s32.totalorder %s1054_s27, 0  ;;  %s265_s29 = scalar_lea.sflag [#allocation7], %s264_s12 }
 0x117   : > { %p450_p12 = pnand %p453_p13, %p1062_p3 }
 0x119   : > { %748 = dma.done.wait (!%p450_p12), %s265_s29, 128  }
 0x11a   : > { %750 = vsyncadd (!%p450_p12), %s265_s29, 4294967168  ;;  %p16_p4 = scmp.ge.s32.totalorder %s817_s22, 3   ;;  %s1063_s19 = smov %s757_s20 }
 0x11b   : > { %s1064_s20 = smov %s826_s25  ;;  %s1065_s21 = smov %s817_s22 }
 0x11c   :  { %18 = sbr.rel (!%p16_p4) target bundleno = 15 (0xf), region = 105 }
 0x123   :  { %270 = vsyncpa [#allocation7], 1 }
 0x124   :  { %272 = vsyncpa [#allocation7 + $0x1], 1 }
 0x125   :  { %273 = vsyncmov [#allocation3] }
 0x128   :  { %s274_s21 = vpop.sfrf %273 }
 0x129   :  { %p423_p6 = scmp.ne.s32.totalorder %s274_s21, 0 }
 0x12b   :  { %278 = shalt.err (%p423_p6)  }
 0x12c   :  { %280 = vsyncmov [#allocation3 + $0x1] }
 0x12f   :  { %s281_s26 = vpop.sfrf %280 }
 0x130   :  { %p424_p5 = scmp.ne.s32.totalorder %s281_s26, 0 }
 0x132   :  { %285 = shalt.err (%p424_p5)  }
 0x133   :  { %287 = vsyncmov [#allocation3 + $0x2] }
 0x136   :  { %s288_s27 = vpop.sfrf %287 }
 0x137   :  { %p425_p7 = scmp.ne.s32.totalorder %s288_s27, 0 }
 0x139   :  { %292 = shalt.err (%p425_p7)  }
 0x13a   :  { %294 = vsyncmov [#allocation3 + $0x3] }
 0x13d   :  { %s295_s7 = vpop.sfrf %294 }
 0x13e   :  { %p426_p1 = scmp.ne.s32.totalorder %s295_s7, 0 }
 0x140   :  { %299 = shalt.err (%p426_p1)  }
 0x141   :  { %301 = vsyncmov [#allocation3 + $0x4] }
 0x144   :  { %s302_s22 = vpop.sfrf %301 }
 0x145   :  { %p427_p0 = scmp.ne.s32.totalorder %s302_s22, 0 }
 0x147   :  { %306 = shalt.err (%p427_p0)  }
 0x148   :  { %308 = vsyncmov [#allocation3 + $0x5] }
 0x14b   :  { %s309_s1 = vpop.sfrf %308 }
 0x14c   :  { %p428_p2 = scmp.ne.s32.totalorder %s309_s1, 0 }
 0x14e   :  { %313 = shalt.err (%p428_p2)  }
 0x14f   :  { %315 = vsyncmov [#allocation3 + $0x6] }
 0x152   :  { %s316_s2 = vpop.sfrf %315 }
 0x153   :  { %p429_p10 = scmp.ne.s32.totalorder %s316_s2, 0 }
 0x155   :  { %320 = shalt.err (%p429_p10)  }
 0x156   :  { %322 = vsyncmov [#allocation3 + $0x7] }
 0x159   :  { %s323_s19 = vpop.sfrf %322 }
 0x15a   :  { %p430_p11 = scmp.ne.s32.totalorder %s323_s19, 0 }
 0x15c   :  { %327 = shalt.err (%p430_p11)  }

</bundles_post_ra>
